<compile_context>
chip_gen: v7x
topology: tpu7x:2x2x1
jax: 0.10.0
libtpu: 0.0.40
codegen_flags: <defaults>
</compile_context>

<pallas_src>
import math
from functools import partial

import jax
import jax.numpy as jnp
from jax.experimental import pallas as pl
from jax.experimental.pallas import tpu as pltpu


def _eca_kernel_size(channels, gamma=2, b=1):
    k = int(abs((math.log(channels, 2) + b) / gamma))
    return k if k % 2 else k + 1


def _cdiv(a, b):
    return (a + b - 1) // b


def _round_up(a, b):
    return _cdiv(a, b) * b


def _default_block_bytes():
    """4 MiB blocks everywhere; 8 MiB where VMEM is large (v5e/v6e: 128 MiB)."""
    try:
        vmem = int(getattr(pltpu.get_tpu_info(), "vmem_capacity_bytes", 0))
    except Exception:
        vmem = 0
    return 8 * 1024 * 1024 if vmem >= 96 * 1024 * 1024 else 4 * 1024 * 1024


def _channel_conv_sigmoid(w_ref, v, k, pad):
    """k-tap 'same' Conv1d over the channel axis of v (C, 1), then sigmoid.

    conv[c] = sum_j w[j] * v[c + j - pad]   (zero padded; matches nn.Conv1d).
    Done as k scalar(SMEM)-weighted shifted slices -- no (C, C) Toeplitz matmul.
    """
    c = v.shape[0]
    if pad > 0:
        z = jnp.zeros((pad, 1), jnp.float32)
        vp = jnp.concatenate([z, v, z], axis=0)               # (C + 2*pad, 1)
    else:
        vp = v
    conv = jnp.zeros((c, 1), jnp.float32)
    for j in range(k):                                        # k in {1, 3, 5, 7}
        conv = conv + w_ref[j] * jax.lax.slice(vp, (j, 0), (j + c, 1))
    return jax.nn.sigmoid(conv)                               # (C, 1)


# --------------------------------------------------------------------------- #
# Fused single-pass kernel: the whole (C, HW) slab of one batch is resident.  #
# --------------------------------------------------------------------------- #
def _eca_fused_kernel(w_ref, x_ref, o_ref, *, hw, k, pad):
    x = x_ref[0].astype(jnp.float32)                          # (C, HW)
    v = (jnp.sum(x, axis=-1, keepdims=True) * (1.0 / hw)
         + jnp.max(x, axis=-1, keepdims=True))                # (C, 1)
    gate = _channel_conv_sigmoid(w_ref, v, k, pad)            # (C, 1)
    o_ref[...] = (x * gate).astype(o_ref.dtype)[None]         # (1, C, HW)


# --------------------------------------------------------------------------- #
# Two-pass fallback for large C * HW.                                          #
# --------------------------------------------------------------------------- #
def _pool_gate_kernel(w_ref, x_ref, gate_ref, sum_sc, max_sc, *,
                      hw, tile, k, pad, ragged):
    """Fused avg+max pooling over HW, then channel conv + sigmoid gate.

    w_ref   : (k,) f32 conv taps in SMEM
    x_ref   : (1, C, tile) native-dtype tile of the input
    gate_ref: (1, C, 1) f32 gate (written on the last spatial tile)
    sum_sc  : (C, 1) f32 running sum      max_sc: (C, 1) f32 running max
    """
    t = pl.program_id(1)
    nt = pl.num_programs(1)

    @pl.when(t == 0)
    def _init():
        sum_sc[...] = jnp.zeros_like(sum_sc)
        max_sc[...] = jnp.full_like(max_sc, -jnp.inf)

    x = x_ref[0].astype(jnp.float32)                          # (C, tile)

    if ragged:
        @pl.when(t < nt - 1)
        def _full_tile():
            sum_sc[...] += jnp.sum(x, axis=-1, keepdims=True)
            max_sc[...] = jnp.maximum(max_sc[...],
                                      jnp.max(x, axis=-1, keepdims=True))

        @pl.when(t == nt - 1)
        def _tail_tile():
            # No HBM-side padding -> out-of-range lanes of the last block are
            # unspecified: mask BOTH the sum and the max.
            lane = jax.lax.broadcasted_iota(jnp.int32, x.shape, 1) + t * tile
            valid = lane < hw
            sum_sc[...] += jnp.sum(jnp.where(valid, x, 0.0),
                                   axis=-1, keepdims=True)
            max_sc[...] = jnp.maximum(
                max_sc[...],
                jnp.max(jnp.where(valid, x, -jnp.inf), axis=-1, keepdims=True))
    else:
        sum_sc[...] += jnp.sum(x, axis=-1, keepdims=True)
        max_sc[...] = jnp.maximum(max_sc[...],
                                  jnp.max(x, axis=-1, keepdims=True))

    @pl.when(t == nt - 1)
    def _finish():
        v = sum_sc[...] * (1.0 / hw) + max_sc[...]            # (C, 1)
        gate_ref[...] = _channel_conv_sigmoid(w_ref, v, k, pad)[None]


def _scale_kernel(x_ref, gate_ref, o_ref):
    # (1, C, tile) * (1, C, 1) lane-broadcast multiply; cast back to I/O dtype.
    o_ref[...] = (x_ref[...].astype(jnp.float32)
                  * gate_ref[...]).astype(o_ref.dtype)


# --------------------------------------------------------------------------- #
# Wrapper                                                                      #
# --------------------------------------------------------------------------- #
def eca_block(x_nchw, w_taps, *, max_block_bytes=None, max_fused_bytes=None):
    """x_nchw: (B, C, H, W); w_taps: (k,) Conv1d weights (no bias)."""
    B, C, H, W = x_nchw.shape
    HW = H * W
    k = int(w_taps.shape[0])
    pad = (k - 1) // 2
    dtype = x_nchw.dtype
    itemsize = jnp.dtype(dtype).itemsize

    if max_block_bytes is None:
        max_block_bytes = _default_block_bytes()
    if max_fused_bytes is None:
        max_fused_bytes = max_block_bytes
    vmem_limit = max(32 * 1024 * 1024, 4 * max_block_bytes + 16 * 1024 * 1024)

    x = x_nchw.reshape(B, C, HW)                   # free reshape, native dtype
    w = jnp.asarray(w_taps, jnp.float32).reshape(k)
    hw128 = _round_up(HW, 128)

    # ---- Fused single-pass path: x is read from HBM exactly once. ----------
    if C * hw128 * 4 <= max_fused_bytes:
        out = pl.pallas_call(
            partial(_eca_fused_kernel, hw=HW, k=k, pad=pad),
            out_shape=jax.ShapeDtypeStruct((B, C, HW), dtype),
            grid_spec=pltpu.PrefetchScalarGridSpec(
                num_scalar_prefetch=0,
                grid=(B,),
                in_specs=[
                    pl.BlockSpec(memory_space=pltpu.MemorySpace.SMEM),  # taps
                    pl.BlockSpec((1, C, HW), lambda b: (b, 0, 0)),
                ],
                out_specs=pl.BlockSpec((1, C, HW), lambda b: (b, 0, 0)),
            ),
            compiler_params=pltpu.CompilerParams(
                dimension_semantics=("parallel",),
                vmem_limit_bytes=vmem_limit),
        )(w, x)
        return out.reshape(B, C, H, W)

    # ---- Two-pass fallback for large C * HW. --------------------------------
    # Lane-dense spatial tiling: tile is a multiple of 128, <= max_block_bytes,
    # and balanced so trailing waste stays under one 128-lane group. No HBM pad.
    max_tile = max(128, (max_block_bytes // (C * itemsize)) // 128 * 128)
    max_tile = min(max_tile, hw128)
    n_split = _cdiv(hw128, max_tile)
    tile = _round_up(_cdiv(hw128, n_split), 128)
    n_t = _cdiv(HW, tile)
    ragged = (HW % tile) != 0

    # TODO(synk): for B < num TensorCores (v7x), split HW on a leading parallel
    # axis producing per-core partial sum/max so pass 1 uses both cores.

    # Pass 1: pooled stats -> in-kernel channel conv -> sigmoid gate (B, C, 1).
    gate = pl.pallas_call(
        partial(_pool_gate_kernel, hw=HW, tile=tile, k=k, pad=pad,
                ragged=ragged),
        out_shape=jax.ShapeDtypeStruct((B, C, 1), jnp.float32),
        grid_spec=pltpu.PrefetchScalarGridSpec(
            num_scalar_prefetch=0,
            grid=(B, n_t),
            in_specs=[
                pl.BlockSpec(memory_space=pltpu.MemorySpace.SMEM),      # taps
                pl.BlockSpec((1, C, tile), lambda b, t: (b, 0, t)),     # x
            ],
            out_specs=pl.BlockSpec((1, C, 1), lambda b, t: (b, 0, 0)),
            scratch_shapes=[pltpu.VMEM((C, 1), jnp.float32),
                            pltpu.VMEM((C, 1), jnp.float32)],
        ),
        compiler_params=pltpu.CompilerParams(
            dimension_semantics=("parallel", "arbitrary"),
            vmem_limit_bytes=vmem_limit),
    )(w, x)

    # Pass 2: out = x * gate, fully parallel tiled elementwise scale.
    # Partial edge blocks are clipped by Pallas on the write side.
    out = pl.pallas_call(
        _scale_kernel,
        out_shape=jax.ShapeDtypeStruct((B, C, HW), dtype),
        grid_spec=pltpu.PrefetchScalarGridSpec(
            num_scalar_prefetch=0,
            grid=(B, n_t),
            in_specs=[
                pl.BlockSpec((1, C, tile), lambda b, t: (b, 0, t)),
                pl.BlockSpec((1, C, 1), lambda b, t: (b, 0, 0)),
            ],
            out_specs=pl.BlockSpec((1, C, tile), lambda b, t: (b, 0, t)),
        ),
        compiler_params=pltpu.CompilerParams(
            dimension_semantics=("parallel", "parallel"),
            vmem_limit_bytes=vmem_limit),
    )(x, gate)

    return out.reshape(B, C, H, W)


def eca_block_ref(x_nchw, w_taps):
    """Pure-JAX reference for verification."""
    B, C, H, W = x_nchw.shape
    k = w_taps.shape[0]
    pad = (k - 1) // 2
    xf = x_nchw.astype(jnp.float32)
    avg = jnp.mean(xf, axis=(2, 3))                     # (B, C)
    mx = jnp.max(xf, axis=(2, 3))                       # (B, C)
    v = avg + mx
    vp = jnp.pad(v, ((0, 0), (pad, pad)))
    conv = sum(w_taps[j] * vp[:, j:j + C] for j in range(k))
    gate = jax.nn.sigmoid(conv)
    return (xf * gate[:, :, None, None]).astype(x_nchw.dtype)


if __name__ == "__main__":
    B, C, H, W = 2, 16, 16, 16          # C=16 -> kernel_size 3 (PyTorch formula)
    k = _eca_kernel_size(C)

    key = jax.random.PRNGKey(0)
    kx, kw, kx2 = jax.random.split(key, 3)
    x = jax.random.normal(kx, (B, C, H, W), dtype=jnp.float32)
    # Deterministic Conv1d(1, 1, k, bias=False) weights: U(-1/sqrt(k), 1/sqrt(k)).
    bound = 1.0 / math.sqrt(k)
    w_taps = jax.random.uniform(kw, (k,), minval=-bound, maxval=bound,
                                dtype=jnp.float32)

    # 1) Fused single-pass path (small HW, multiple of 128).
    out = jax.block_until_ready(eca_block(x, w_taps))
    ref = eca_block_ref(x, w_taps)
    assert out.shape == (B, C, H, W) and out.dtype == x.dtype
    assert jnp.allclose(out, ref, atol=1e-5, rtol=1e-5), "fused mismatch"

    # 2) Ragged HW (15x15 = 225 lanes) on the fused path (full-dim block).
    x2 = jax.random.normal(kx2, (B, C, 15, 15), dtype=jnp.float32)
    out2 = jax.block_until_ready(eca_block(x2, w_taps))
    ref2 = eca_block_ref(x2, w_taps)
    assert jnp.allclose(out2, ref2, atol=1e-5, rtol=1e-5), "fused ragged mismatch"

    # 3) Forced two-pass fallback with a tiny block budget: multi-tile f32
    #    accumulation, in-kernel tail masking of sum+max, and Pallas-clipped
    #    partial output block writes (no HBM padding anywhere).
    out3 = jax.block_until_ready(
        eca_block(x2, w_taps, max_fused_bytes=0, max_block_bytes=8 * 1024))
    assert jnp.allclose(out3, ref2, atol=1e-5, rtol=1e-5), "two-pass mismatch"

    print("KERNEL_OK")
</pallas_src>

<mosaic_0001>
module attributes {stable_mosaic.version = 11 : i64} {
  func.func @_eca_fused_kernel(%arg0: i32, %arg1: memref<3xf32, #tpu.memory_space<smem>>, %arg2: memref<1x16x256xf32, #tpu.memory_space<vmem>>, %arg3: memref<1x16x256xf32, #tpu.memory_space<vmem>>) attributes {dimension_semantics = [#tpu.dimension_semantics<parallel>], iteration_bounds = array<i64: 2>, scalar_prefetch = 0 : i64, scratch_operands = 0 : i64, tpu.core_type = #tpu.core_type<tc>, window_params = [{transform_indices = @transform_0, window_bounds = array<i64: 3>}, {transform_indices = @transform_1, window_bounds = array<i64: 1, 16, 256>}, {transform_indices = @transform_2, window_bounds = array<i64: 1, 16, 256>}]} {
    %c0 = arith.constant 0 : index
    %c0_0 = arith.constant 0 : index
    %c0_1 = arith.constant 0 : index
    %0 = vector.load %arg2[%c0, %c0_0, %c0_1] : memref<1x16x256xf32, #tpu.memory_space<vmem>>, vector<1x16x256xf32>
    %1 = vector.shape_cast %0 : vector<1x16x256xf32> to vector<16x256xf32>
    %cst = arith.constant dense<0.000000e+00> : vector<16xf32>
    %2 = vector.multi_reduction <add>, %1, %cst [1] : vector<16x256xf32> to vector<16xf32>
    %3 = vector.shape_cast %2 : vector<16xf32> to vector<16x1xf32>
    %cst_2 = arith.constant 3.906250e-03 : f32
    %4 = vector.broadcast %cst_2 : f32 to vector<16x1xf32>
    %5 = arith.mulf %3, %4 : vector<16x1xf32>
    %cst_3 = arith.constant dense<0xFF800000> : vector<16xf32>
    %6 = vector.multi_reduction <maximumf>, %1, %cst_3 [1] : vector<16x256xf32> to vector<16xf32>
    %7 = vector.shape_cast %6 : vector<16xf32> to vector<16x1xf32>
    %8 = arith.addf %5, %7 : vector<16x1xf32>
    %cst_4 = arith.constant 0.000000e+00 : f32
    %9 = vector.broadcast %cst_4 : f32 to vector<1x1xf32>
    %10 = tpu.concatenate %9, %8, %9 in 0 : vector<1x1xf32>, vector<16x1xf32>, vector<1x1xf32> -> vector<18x1xf32>
    %cst_5 = arith.constant 0.000000e+00 : f32
    %11 = vector.broadcast %cst_5 : f32 to vector<16x1xf32>
    %c0_6 = arith.constant 0 : index
    %12 = memref.load %arg1[%c0_6] : memref<3xf32, #tpu.memory_space<smem>>
    %13 = vector.extract_strided_slice %10 {offsets = [0, 0], sizes = [16, 1], strides = [1, 1]} : vector<18x1xf32> to vector<16x1xf32>
    %14 = vector.broadcast %12 : f32 to vector<16x1xf32>
    %15 = arith.mulf %14, %13 : vector<16x1xf32>
    %16 = arith.addf %11, %15 : vector<16x1xf32>
    %c1 = arith.constant 1 : index
    %17 = memref.load %arg1[%c1] : memref<3xf32, #tpu.memory_space<smem>>
    %18 = vector.extract_strided_slice %10 {offsets = [1, 0], sizes = [16, 1], strides = [1, 1]} : vector<18x1xf32> to vector<16x1xf32>
    %19 = vector.broadcast %17 : f32 to vector<16x1xf32>
    %20 = arith.mulf %19, %18 : vector<16x1xf32>
    %21 = arith.addf %16, %20 : vector<16x1xf32>
    %c2 = arith.constant 2 : index
    %22 = memref.load %arg1[%c2] : memref<3xf32, #tpu.memory_space<smem>>
    %23 = vector.extract_strided_slice %10 {offsets = [2, 0], sizes = [16, 1], strides = [1, 1]} : vector<18x1xf32> to vector<16x1xf32>
    %24 = vector.broadcast %22 : f32 to vector<16x1xf32>
    %25 = arith.mulf %24, %23 : vector<16x1xf32>
    %26 = arith.addf %21, %25 : vector<16x1xf32>
    %27 = arith.negf %26 : vector<16x1xf32>
    %28 = math.exp %27 : vector<16x1xf32>
    %cst_7 = arith.constant 1.000000e+00 : f32
    %29 = vector.broadcast %cst_7 : f32 to vector<16x1xf32>
    %30 = arith.addf %29, %28 : vector<16x1xf32>
    %31 = arith.divf %29, %30 : vector<16x1xf32>
    %32 = vector.broadcast %31 : vector<16x1xf32> to vector<16x256xf32>
    %33 = arith.mulf %1, %32 : vector<16x256xf32>
    %34 = vector.shape_cast %33 : vector<16x256xf32> to vector<1x16x256xf32>
    %c0_8 = arith.constant 0 : index
    %c0_9 = arith.constant 0 : index
    %c0_10 = arith.constant 0 : index
    %35 = vector.load %arg3[%c0_8, %c0_9, %c0_10] : memref<1x16x256xf32, #tpu.memory_space<vmem>>, vector<1x16x256xf32>
    tpu.vector_store %arg3[%c0_8, %c0_9, %c0_10], %34 {strides = array<i32>} : memref<1x16x256xf32, #tpu.memory_space<vmem>>, vector<1x16x256xf32>,
    return
  }
  func.func @transform_0(%arg0: i32) -> i32 {
    %c0_i32 = arith.constant 0 : i32
    %c0_i32_0 = arith.constant 0 : i32
    return %c0_i32 : i32
  }
  func.func @transform_1(%arg0: i32) -> (i32, i32, i32) {
    %c0_i32 = arith.constant 0 : i32
    %c0_i32_0 = arith.constant 0 : i32
    %c0_i32_1 = arith.constant 0 : i32
    return %arg0, %c0_i32, %c0_i32_0 : i32, i32, i32
  }
  func.func @transform_2(%arg0: i32) -> (i32, i32, i32) {
    %c0_i32 = arith.constant 0 : i32
    %c0_i32_0 = arith.constant 0 : i32
    %c0_i32_1 = arith.constant 0 : i32
    return %arg0, %c0_i32, %c0_i32_0 : i32, i32, i32
  }
}

</mosaic_0001>

<bundles_post_ra>
// kernel: tpu_custom_call.1
= control target key start
LH: loop header
LB: loop body
LE: loop exit
PB: predicated region body
PF: predicated region fallthrough
CT: control target
= control target key end

     0   :  { %7 = vsyncpa [#allocation5], 0  ;;  %s822_s0 = inlined_call_operand.hbm [shape: f32[3], index: 0, kind: input, shape index: {}]   ;;  %s823_s1 = inlined_call_operand.hbm [shape: f32[2,16,256], index: 1, kind: input, shape index: {}]   ;;  %s824_s2 = inlined_call_operand.hbm [shape: f32[2,16,256], index: 2, kind: output, shape index: {}]  }
   0x1   :  { %8 = vsyncpa [#allocation3], 0 }
   0x2   :  { %10 = vsyncpa [#allocation3 + $0x1], 0 }
   0x3   :  { %11 = vsyncpa [#allocation4], 0 }
   0x4   :  { %13 = vsyncpa [#allocation4 + $0x1], 0  ;;  %s608_s9 = smov 0   ;;  %s610_s10 = smov 0  }
   0x5   :  { %s612_s11 = smov 0   ;;  %s614_s12 = smov 0  }
   0x6 LB: > { %s629_s13 = sadd.s32 4294967295, %s583_s12   ;;  %s376_s14 = sadd.s32 4294967294, %s583_s12   ;;  %s583_s12 = sphi %s614_s12, %s844_s12   ;;  %s579_s11 = sphi %s612_s11, %s843_s11   ;;  %s575_s10 = sphi %s610_s10, %s842_s10   ;;  %s571_s9 = sphi %s608_s9, %s841_s9  }
   0x7   : > { %s633_s15 = sadd.s32 1, %s583_s12   ;;  %s47_s16 = sadd.s32 1, %s579_s11 }
   0x8   : > { %s44_s17 = ssub.s32 %s583_s12, %s633_s15  ;;  %p54_p0 = scmp.ne.s32.totalorder %s579_s11, %s575_s10 }
   0x9   : > { %p45_p1 = scmp.eq.s32.totalorder %s44_s17, 0  ;;  %p55_p2 = scmp.eq.s32.totalorder %s583_s12, 0 }
   0xa   : > { %p60_p3 = scmp.ne.s32.totalorder %s575_s10, %s571_s9  ;;  %p825_p4 = scmp.eq.s32.totalorder %s629_s13, 0 }
   0xb   : > { %s645_s18 = scalar_select %p45_p1, %s579_s11, %s47_s16  }
   0xc   : > { %p647_p5 = por %p55_p2, %p54_p0  ;;  %p653_p6 = por %p825_p4, %p60_p3 }
   0xd   : > { %p84_p7 = scmp.eq.s32.totalorder %s629_s13, 1  ;;  %p90_p8 = scmp.eq.s32.totalorder %s376_s14, 1 }
   0xe   : > { %s829_s20 = scalar_select %p653_p6, 1, 0 }
   0xf   : > { %p377_p9 = scmp.ge.s32.totalorder %s583_s12, 1  ;;  %p97_p10 = scmp.lt.s32.totalorder %s583_s12, 3 }
  0x10   : > { %p660_p11 = por %p84_p7, %p54_p0  ;;  %p664_p12 = por %p90_p8, %p60_p3 }
  0x11   : > { %p668_p13 = pnand %p377_p9, %p97_p10  ;;  %p419_p4 = scmp.lt.s32.totalorder %s583_s12, 2 }
  0x12   : > { %s830_s21 = scalar_select %p660_p11, 1, 0 }
  0x13   : > { %s831_s22 = scalar_select %p664_p12, 1, 0 }
  0x14   : > { %p406_p2 = pneg %p668_p13  ;;  %s119_s24 = sand.u32 1, %s579_s11  }
  0x15   : > { %s396_s25 = sshll.u32 %s583_s12, 9  ;;  %p833_p6 = scmp.eq.s32.totalorder %s629_s13, 0 }
  0x16   : > { %p682_p7 = pnand %p419_p4, %p647_p5  ;;  %s380_s27 = sshll.u32 %s119_s24, 5 }
  0x17   : > { %p407_p0 = pnand %p406_p2, %p833_p6  ;;  %s470_s30 = scalar_lea.hbm %s822_s0, 16 }
  0x18   : > { %p471_p3 = scmp.ne.s32.totalorder %s822_s0, %s470_s30  ;;  %p477_p6 = scmp.lt.u32.totalorder %s470_s30, %s822_s0 }
  0x19   : > { %p472_p8 = pneg %p407_p0 }
  0x1b   : > { %p473_p9 = pnand %p472_p8, %p471_p3 }
  0x1d   : > { %p474_p10 = pneg %p473_p9 }
  0x1f   : > { %p479_p4 = pnand %p477_p6, %p474_p10 }
  0x21   : > { %482 = shalt.err (!%p479_p4)
}
  0x22   : > { %s585_s7 = smov [#allocation2]   ;;  %s701_s19 = scalar_lea.hbm %s823_s1, %s396_s25 }
  0x23   : > { %409 = dma.hbm_to_smem (!%p407_p0), %s822_s0, 16, %s585_s7, [#allocation5]  }
  0x24   : > { %s123_s28 = scalar_lea.vmem [#allocation6], %s380_s27  ;;  %s705_s30 = scalar_lea.sflag [#allocation3], %s119_s24 }
  0x25   : > { %s130_s29 = sshll.u32 %s123_s28, 4  ;;  %s483_s3 = scalar_lea.hbm %s701_s19, 512  ;;  %s703_s29 = int_to_ptr.vmem [resolvable:$true] %s130_s29 }
  0x26   : > { %p484_p5 = scmp.ne.s32.totalorder %s701_s19, %s483_s3  ;;  %p485_p2 = pneg %p682_p7 }
  0x27   : > { %s488_s5 = scalar_lea.hbm %s823_s1, 1024  ;;  %p489_p8 = scmp.lt.u32.totalorder %s701_s19, %s823_s1 }
  0x28   : > { %p486_p0 = pnand %p485_p2, %p484_p5  ;;  %p490_p9 = scmp.lt.u32.totalorder %s488_s5, %s483_s3 }
  0x29   : > { %p492_p6 = scmp.lt.u32.totalorder %s483_s3, %s701_s19 }
  0x2a   : > { %p487_p3 = pneg %p486_p0  ;;  %p491_p10 = por %p490_p9, %p489_p8 }
  0x2c   : > { %p493_p4 = por %p492_p6, %p491_p10 }
  0x2e   : > { %p494_p1 = pnand %p493_p4, %p487_p3 }
  0x30   : > { %497 = shalt.err (!%p494_p1)
}
  0x31   : > { %s498_s24 = scalar_lea.vmem %s703_s29, 512  ;;  %s586_s27 = smov [#allocation6]  }
  0x32   : > { %p499_p5 = scmp.ne.s32.totalorder %s703_s29, %s498_s24  ;;  %s503_s8 = sshll.u32 %s586_s27, 4  ;;  %s504_s8 = int_to_ptr.vmem [resolvable:$false] %s503_s8 }
  0x33   : > { %s505_s14 = scalar_lea.vmem %s504_s8, 1024  ;;  %p506_p11 = scmp.lt.s32.totalorder %s703_s29, %s504_s8 }
  0x34   : > { %p501_p0 = pnand %p499_p5, %p485_p2  ;;  %p507_p8 = scmp.lt.s32.totalorder %s505_s14, %s498_s24 }
  0x36   : > { %p502_p12 = pneg %p501_p0  ;;  %p508_p9 = por %p507_p8, %p506_p11 }
  0x38   : > { %p509_p10 = pnand %p508_p9, %p502_p12 }
  0x3a   : > { %512 = shalt.err (!%p509_p10)
}
  0x3b   : > { %s587_s16 = smov 256   ;;  %s588_s17 = smov 16  }
  0x3c   : > { %413 = dma.hbm_to_vmem [thread:$0]  (!%p682_p7), %s701_s19, 512, %s703_s29, %s705_s30, %s587_s16, %s587_s16, %s588_s17  }
  0x3d   : > { %142 = sbr.rel (%p668_p13) target bundleno = 412 (0x19c), region = 28  ;;  %p835_p1 = scmp.eq.s32.totalorder (!%p668_p13), %s629_s13, 0 }
  0x44   : > { %558 = dma.done.wait (%p835_p1), [#allocation5], 16   ;;  %p836_p2 = pmov %p835_p1 }
  0x45   : > { %s740_s28 = sand.u32 1, %s575_s10   ;;  %p837_p11 = scmp.ne.s32.totalorder %s829_s20, 0 }
  0x46   : > { %560 = vsyncadd (%p836_p2), [#allocation5], 4294967280  ;;  %s385_s3 = sshll.u32 %s740_s28, 5  ;;  %s149_s25 = scalar_lea.sflag [#allocation3], %s740_s28 }
  0x47   : > { %s152_s26 = scalar_lea.vmem [#allocation6], %s385_s3 }
  0x48   : > { %562 = dma.done.wait (%p837_p11), %s149_s25, 512  }
  0x49   : > { %564 = vsyncadd (%p837_p11), %s149_s25, 4294966784 }
  0x4a   : > { %157 = sfence }
  0x4b   : > { %v750_v0 = vld [vmem:[%s152_s26] sm:$0xff]  ;;  %v752_v1 = vld [vmem:[%s152_s26 + $0x8] sm:$0xff]  ;;  %v754_v2 = vld [vmem:[%s152_s26 + $0x10] sm:$0xff]  ;;  %v589_v8 = vmov 0   ;;  %s387_s20 = sld [smem:[#allocation2 + $0x1]]  ;;  %s388_s23 = sld [smem:[#allocation2 + $0x2]] }
  0x4c   : > { %v178_v3 = vadd.f32 %v752_v1, %v750_v0  ;;  %v186_v4 = vmax.f32 %v750_v0, %v752_v1  ;;  %v760_v5 = vld [vmem:[%s152_s26 + $0x18] sm:$0xff]  ;;  %461 = vset.pattern.permute.xlu1 %v589_v8  ;;  %460 = vset.pattern.permute.xlu0 %v589_v8  ;;  %s205_s19 = sld [smem:[#allocation2]]  ;;  %vm196_vm0 = vcmask 1040384   ;;  %vm219_vm1 = vcmask 1046528   ;;  %s173_s29 = scalar_lea.vmem [#allocation7], %s385_s3 }
  0x4d   : > { %v181_v6 = vadd.f32 %v760_v5, %v754_v2  ;;  %v189_v7 = vmax.f32 %v754_v2, %v760_v5  ;;  %vm237_vm2 = vcmask 1045504   ;;  %s291_s30 = sshll.u32 %s173_s29, 4  ;;  %s397_s4 = sshll.u32 %s629_s13, 9  ;;  %s769_s30 = int_to_ptr.vmem [resolvable:$true] %s291_s30 }
  0x4e   : > { %179 = vadd.xlane.f32.xlu0 %v178_v3  ;;  %187 = vmax.xlane.f32.xlu1 %v186_v4  ;;  %s776_s7 = scalar_lea.hbm %s824_s2, %s397_s4  ;;  %s278_s13 = scalar_lea.sflag [#allocation4], %s740_s28 }
  0x4f   : > { %s513_s24 = scalar_lea.vmem %s769_s30, 512  ;;  %p838_p13 = scmp.ne.s32.totalorder %s830_s21, 0 }
  0x50   : > { %p514_p12 = scmp.ne.s32.totalorder %s769_s30, %s513_s24  ;;  %s590_s27 = smov [#allocation7]  }
  0x51   : > { %v212_v17 = vstv %s387_s20  ;;  %v230_v20 = vstv %s388_s23  ;;  %s517_s8 = sshll.u32 %s590_s27, 4  ;;  %s518_s8 = int_to_ptr.vmem [resolvable:$false] %s517_s8 }
  0x52   : > { %182 = vadd.xlane.f32.xlu0 %v181_v6  ;;  %190 = vmax.xlane.f32.xlu1 %v189_v7  ;;  %v206_v23 = vstv %s205_s19  ;;  %p515_p7 = pnand %p514_p12, %p838_p13  ;;  %s519_s14 = scalar_lea.vmem %s518_s8, 1024 }
  0x53   : > { %p520_p6 = scmp.lt.s32.totalorder %s769_s30, %s518_s8  ;;  %p521_p4 = scmp.lt.s32.totalorder %s519_s14, %s513_s24 }
  0x54   : > { %p516_p3 = pneg %p515_p7 }
  0x55   : > { %p522_p5 = por %p521_p4, %p520_p6 }
  0x57   : > { %p523_p0 = pnand %p522_p5, %p516_p3 }
  0xdb   : > { %v180_v9 = vpop.xlane.xlu0 %179  ;;  %v188_v10 = vpop.xlane.xlu1 %187 }
  0xdc   : > { %v184_v11 = vmul.f32 0.00390625, %v180_v9 }
  0xde   : > { %v192_v12 = vadd.f32 %v188_v10, %v184_v11 }
  0xdf   : > { %v183_v13 = vpop.xlane.xlu0 %182  ;;  %v191_v14 = vpop.xlane.xlu1 %190 }
  0xe0   : > { %v197_v15 = vrot.slane %v192_v12, 7  ;;  %v185_v16 = vmul.f32 0.00390625, %v183_v13 }
  0xe2   : > { %v203_v18 = vsel %vm196_vm0, 0.0, %v197_v15  ;;  %v193_v19 = vadd.f32 %v191_v14, %v185_v16 }
  0xe3   : > { %v213_v22 = vmul.f32 %v212_v17, %v203_v18  ;;  %v231_v26 = vmul.f32 %v230_v20, %v203_v18  ;;  %v207_v35 = vmul.f32 %v206_v23, %v203_v18 }
  0xe4   : > { %v198_v21 = vrot.slane %v193_v19, 7 }
  0xe5   : > { %v220_v31 = vrot.slane %v213_v22, 1  ;;  %v238_v38 = vrot.slane %v231_v26, 2 }
  0xe6   : > { %v199_v24 = vsel %vm196_vm0, %v197_v15, %v198_v21  ;;  %v204_v25 = vsel %vm196_vm0, %v198_v21, 0.0 }
  0xe7   : > { %v214_v27 = vmul.f32 %v212_v17, %v199_v24  ;;  %v215_v28 = vmul.f32 %v212_v17, %v204_v25  ;;  %v232_v29 = vmul.f32 %v230_v20, %v199_v24  ;;  %v233_v30 = vmul.f32 %v230_v20, %v204_v25 }
  0xe8   : > { %v208_v36 = vmul.f32 %v206_v23, %v199_v24 }
  0xe9   : > { %v221_v32 = vrot.slane %v214_v27, 1  ;;  %v223_v33 = vrot.slane %v215_v28, 1  ;;  %v239_v34 = vrot.slane %v232_v29, 2  ;;  %v241_v37 = vrot.slane %v233_v30, 2 }
  0xeb   : > { %v222_v39 = vsel %vm219_vm1, %v220_v31, %v221_v32  ;;  %v224_v40 = vsel %vm219_vm1, %v221_v32, %v223_v33  ;;  %v240_v43 = vsel %vm237_vm2, %v238_v38, %v239_v34  ;;  %v242_v44 = vsel %vm237_vm2, %v239_v34, %v241_v37 }
  0xec   : > { %v227_v41 = vadd.f32 %v222_v39, %v207_v35  ;;  %v228_v42 = vadd.f32 %v224_v40, %v208_v36 }
  0xee   : > { %v245_v45 = vadd.f32 %v240_v43, %v227_v41  ;;  %v246_v46 = vadd.f32 %v242_v44, %v228_v42 }
  0xf0   : > { %v389_v47 = vmul.f32 -1.442695, %v245_v45  ;;  %v390_v48 = vmul.f32 -1.442695, %v246_v46 }
  0xf2   : > { %462 = vpow2.f32 %v389_v47 }
  0xf3   : > { %464 = vpow2.f32 %v390_v48 }
  0xfc   : > { %v463_v49 = vpop.eup %462 }
  0xfd   : > { %v465_v50 = vpop.eup %464  ;;  %v253_v51 = vadd.f32 1.0, %v463_v49 }
  0xfe   : > { %v254_v52 = vadd.f32 1.0, %v465_v50 }
  0xff   : > { %466 = vrcp.f32 %v253_v51 }
 0x100   : > { %468 = vrcp.f32 %v254_v52 }
 0x109   : > { %v467_v53 = vpop.eup %466 }
 0x10a   : > { %v469_v54 = vpop.eup %468  ;;  %261 = vperm.xlu0 %460, %v467_v53  }
 0x10b   : > { %266 = vperm.xlu1 %461, %v469_v54  }
 0x189   : > { %v262_v55 = vpop.permute.xlu0 %261 }
 0x18a   : > { %v269_v56 = vmul.f32 %v262_v55, %v750_v0  ;;  %v270_v57 = vmul.f32 %v262_v55, %v752_v1  ;;  %v267_v58 = vpop.permute.xlu1 %266 }
 0x18b   : > { %v271_v59 = vmul.f32 %v267_v58, %v754_v2  ;;  %v272_v60 = vmul.f32 %v267_v58, %v760_v5 }
 0x18c   : > { %273 = vst [vmem:[%s173_s29] sm:$0xff] %v269_v56  ;;  %274 = vst [vmem:[%s173_s29 + $0x8] sm:$0xff] %v270_v57 }
 0x18d   : > { %275 = vst [vmem:[%s173_s29 + $0x10] sm:$0xff] %v271_v59  ;;  %276 = vst [vmem:[%s173_s29 + $0x18] sm:$0xff] %v272_v60 }
 0x18e   : > { %526 = shalt.err (!%p523_p0)
}
 0x18f   : > { %s527_s16 = scalar_lea.hbm %s776_s7, 512  ;;  %s531_s25 = scalar_lea.hbm %s824_s2, 1024 }
 0x190   : > { %p528_p8 = scmp.ne.s32.totalorder %s776_s7, %s527_s16  ;;  %p532_p1 = scmp.lt.u32.totalorder %s776_s7, %s824_s2 }
 0x191   : > { %p533_p2 = scmp.lt.u32.totalorder %s531_s25, %s527_s16  ;;  %p535_p12 = scmp.lt.u32.totalorder %s527_s16, %s776_s7 }
 0x192   : > { %p529_p9 = pnand %p528_p8, %p838_p13 }
 0x193   : > { %p534_p11 = por %p533_p2, %p532_p1 }
 0x194   : > { %p530_p10 = pneg %p529_p9 }
 0x195   : > { %p536_p7 = por %p535_p12, %p534_p11 }
 0x197   : > { %p537_p3 = pnand %p536_p7, %p530_p10 }
 0x199   : > { %540 = shalt.err (!%p537_p3)
}
 0x19a   : > { %s591_s23 = smov 256   ;;  %s592_s19 = smov 16  }
 0x19b   : > { %404 = dma.vmem_to_hbm [thread:$0]  (%p838_p13), %s769_s30, 512, %s776_s7, %s278_s13, %s591_s23, %s591_s23, %s592_s19  }
 0x19c PF: > { %s306_s29 = sand.u32 1, %s571_s9   ;;  %p839_p6 = scmp.ne.s32.totalorder %s831_s22, 0 }
 0x19d   : > { %p840_p4 = scmp.ge.s32.totalorder %s583_s12, 2  ;;  %s307_s4 = scalar_lea.sflag [#allocation4], %s306_s29 }
 0x19f   : > { %p415_p5 = pnand %p840_p4, %p839_p6 }
 0x1a1   : > { %566 = dma.done.wait (!%p415_p5), %s307_s4, 512  }
 0x1a2   : > { %568 = vsyncadd (!%p415_p5), %s307_s4, 4294966784  ;;  %p16_p0 = scmp.ge.s32.totalorder %s633_s15, 4   ;;  %s841_s9 = smov %s575_s10 }
 0x1a3   : > { %s842_s10 = smov %s579_s11  ;;  %s843_s11 = smov %s645_s18 }
 0x1a4   : > { %s844_s12 = smov %s633_s15  ;;  %18 = sbr.rel (!%p16_p0) target bundleno = 6 (0x6), region = 78 }
 0x1ab   :  { %312 = vsyncpa [#allocation3], 1 }
 0x1ac   :  { %314 = vsyncpa [#allocation3 + $0x1], 1 }
 0x1ad   :  { %315 = vsyncpa [#allocation4], 1 }
 0x1ae   :  { %317 = vsyncpa [#allocation4 + $0x1], 1 }
 0x1af   :  { %318 = vsyncpa [#allocation5], 1 }
 0x1b0   :  { %320 = vsyncpa [#allocation5 + $0x1], 1 }

</bundles_post_ra>
